<compile_context>
chip_gen: v5e
topology: v5e:2x2
jax: 0.10.0
libtpu: 0.0.40
codegen_flags: <defaults>
</compile_context>

<pallas_src>
from functools import partial

import jax
import jax.numpy as jnp
from jax import lax
from jax.experimental import pallas as pl
from jax.experimental.pallas import tpu as pltpu


def _concat_conv2d_kernel(x_ref, w_ref, b_ref, o_ref, patch_ref, *,
                          C, W, kH, kW, Ho, Wo, Cout):
    # x_ref:     (1, C, H*W)        channel-major input, spatial on lanes
    # w_ref:     (Cout, kH*kW*C)    time channel already folded out
    # b_ref:     (Cout, 1)          bias + folded time-channel contribution
    # o_ref:     (1, Cout, Ho*Wo)   lane-dense output block
    # patch_ref: (kH*kW*C, Lp)      VMEM scratch: im2col matrix
    x_flat = x_ref[0]                                    # (C, H*W)
    Lp = (Ho - 1) * W + Wo   # exact-fit patch width: max slice end == H*W

    # im2col: each (kh, kw) tap is a contiguous lane-offset slice of the
    # flattened spatial axis (no per-tap (Ho, Wo) reshape/relayout).
    # Row order is (kh, kw, c), matching the wrapper's weight reordering.
    for kh in range(kH):
        for kw in range(kW):
            s = kh * W + kw
            r0 = (kh * kW + kw) * C
            patch_ref[r0:r0 + C, :] = x_flat[:, s:s + Lp]    # (C, Lp)

    # Single MXU GEMM with f32 accumulation, spatial on lanes.
    acc = jnp.dot(w_ref[...], patch_ref[...],
                  preferred_element_type=jnp.float32)        # (Cout, Lp)
    res = (acc + b_ref[...]).astype(o_ref.dtype)

    # Compact the valid columns (drop the kW-1 wrap-around columns at the
    # right edge of each output row) straight into the lane-dense output.
    for i in range(Ho):
        o_ref[0, :, i * Wo:(i + 1) * Wo] = res[:, i * W:i * W + Wo]


def concat_conv2d(t, x_nchw, weight, bias):
    """t: scalar; x_nchw: [N, C, H, W]; weight: [Cout, C+1, kH, kW]; bias: [Cout].

    Returns [N, Cout, Ho, Wo] (NCHW), Ho = H - kH + 1, Wo = W - kW + 1
    (stride=1, padding=0, dilation=1, groups=1, bias=True).
    """
    N, C, H, W = x_nchw.shape
    Cout, Cin, kH, kW = weight.shape
    assert Cin == C + 1
    Ho, Wo = H - kH + 1, W - kW + 1
    Lp = (Ho - 1) * W + Wo

    # Fold the constant time channel into the bias: tt == t at every pixel, so
    # its contribution to every output pixel is t * sum_{kh,kw} weight[:,0,kh,kw].
    # TODO(synk): if t ever becomes per-sample, fold this per batch element.
    t = jnp.asarray(t, jnp.float32)
    eff_bias = bias.astype(jnp.float32) + t * jnp.sum(
        weight[:, 0].astype(jnp.float32), axis=(1, 2))
    b2 = eff_bias.reshape(Cout, 1)

    # Remaining weights reordered (Cout, C, kH, kW) -> (Cout, kH, kW, C) and
    # flattened so the K order (kh, kw, c) matches the kernel's im2col rows.
    w2 = jnp.transpose(weight[:, 1:], (0, 2, 3, 1)).reshape(
        Cout, kH * kW * C).astype(jnp.float32)

    # Contiguous (free) reshape: channels stay major, spatial flattened last.
    x3 = x_nchw.reshape(N, C, H * W)

    kernel = partial(_concat_conv2d_kernel,
                     C=C, W=W, kH=kH, kW=kW, Ho=Ho, Wo=Wo, Cout=Cout)

    out3 = pl.pallas_call(
        kernel,
        out_shape=jax.ShapeDtypeStruct((N, Cout, Ho * Wo), x_nchw.dtype),
        grid_spec=pltpu.PrefetchScalarGridSpec(
            num_scalar_prefetch=0,
            grid=(N,),
            in_specs=[
                pl.BlockSpec((1, C, H * W), lambda n: (n, 0, 0)),
                pl.BlockSpec((Cout, kH * kW * C), lambda n: (0, 0)),
                pl.BlockSpec((Cout, 1), lambda n: (0, 0)),
            ],
            out_specs=pl.BlockSpec((1, Cout, Ho * Wo), lambda n: (n, 0, 0)),
            scratch_shapes=[pltpu.VMEM((kH * kW * C, Lp), jnp.float32)],
        ),
        compiler_params=pltpu.CompilerParams(
            dimension_semantics=("parallel",)),   # batch shards across TCs (v7x)
    )(x3, w2, b2)

    # Free contiguous reshape back to NCHW.
    return out3.reshape(N, Cout, Ho, Wo)


if __name__ == "__main__":
    # Module config: dim_in=4, dim_out=8, ksize=3, stride=1, padding=0, bias=True.
    N, C, H, W = 2, 4, 16, 16
    Cout, K = 8, 3

    key = jax.random.PRNGKey(0)
    kx, kw_, kb = jax.random.split(key, 3)
    x = jax.random.normal(kx, (N, C, H, W), dtype=jnp.float32)
    weight = jax.random.normal(kw_, (Cout, C + 1, K, K), dtype=jnp.float32) * 0.1
    bias = jax.random.normal(kb, (Cout,), dtype=jnp.float32) * 0.1
    t = jnp.float32(0.5)

    out = jax.jit(concat_conv2d)(t, x, weight, bias)
    out = jax.block_until_ready(out)

    # Reference (plain XLA conv on the explicitly concatenated input).
    tt = jnp.ones((N, 1, H, W), jnp.float32) * t
    ttx = jnp.concatenate([tt, x], axis=1)
    ref = lax.conv_general_dilated(
        ttx, weight, window_strides=(1, 1), padding="VALID",
        dimension_numbers=("NCHW", "OIHW", "NCHW"),
    ) + bias[None, :, None, None]

    assert out.shape == (N, Cout, H - K + 1, W - K + 1), out.shape
    assert jnp.allclose(out, ref, atol=1e-4, rtol=1e-4), float(jnp.max(jnp.abs(out - ref)))
    print("KERNEL_OK")
</pallas_src>

<mosaic_0001>
module attributes {stable_mosaic.version = 11 : i64} {
  func.func @_concat_conv2d_kernel(%arg0: i32, %arg1: memref<1x4x256xf32, #tpu.memory_space<vmem>>, %arg2: memref<8x36xf32, #tpu.memory_space<vmem>>, %arg3: memref<8x1xf32, #tpu.memory_space<vmem>>, %arg4: memref<1x8x196xf32, #tpu.memory_space<vmem>>, %arg5: memref<36x222xf32, #tpu.memory_space<vmem>>) attributes {dimension_semantics = [#tpu.dimension_semantics<parallel>], iteration_bounds = array<i64: 2>, scalar_prefetch = 0 : i64, scratch_operands = 1 : i64, tpu.core_type = #tpu.core_type<tc>, window_params = [{transform_indices = @transform_0, window_bounds = array<i64: 1, 4, 256>}, {pipeline_mode = #tpu.pipeline_mode<synchronous>, transform_indices = @transform_1, window_bounds = array<i64: 8, 36>}, {pipeline_mode = #tpu.pipeline_mode<synchronous>, transform_indices = @transform_2, window_bounds = array<i64: 8, 1>}, {transform_indices = @transform_3, window_bounds = array<i64: 1, 8, 196>}]} {
    %c0 = arith.constant 0 : index
    %c0_0 = arith.constant 0 : index
    %c0_1 = arith.constant 0 : index
    %0 = vector.load %arg1[%c0, %c0_0, %c0_1] : memref<1x4x256xf32, #tpu.memory_space<vmem>>, vector<1x4x256xf32>
    %1 = vector.shape_cast %0 : vector<1x4x256xf32> to vector<4x256xf32>
    %2 = vector.extract_strided_slice %1 {offsets = [0, 0], sizes = [4, 222], strides = [1, 1]} : vector<4x256xf32> to vector<4x222xf32>
    %c0_2 = arith.constant 0 : index
    %c0_3 = arith.constant 0 : index
    %3 = vector.load %arg5[%c0_2, %c0_3] : memref<36x222xf32, #tpu.memory_space<vmem>>, vector<4x222xf32>
    tpu.vector_store %arg5[%c0_2, %c0_3], %2 {strides = array<i32>} : memref<36x222xf32, #tpu.memory_space<vmem>>, vector<4x222xf32>,
    %4 = vector.extract_strided_slice %1 {offsets = [0, 1], sizes = [4, 222], strides = [1, 1]} : vector<4x256xf32> to vector<4x222xf32>
    %c4 = arith.constant 4 : index
    %c0_4 = arith.constant 0 : index
    %5 = vector.load %arg5[%c4, %c0_4] : memref<36x222xf32, #tpu.memory_space<vmem>>, vector<4x222xf32>
    tpu.vector_store %arg5[%c4, %c0_4], %4 {strides = array<i32>} : memref<36x222xf32, #tpu.memory_space<vmem>>, vector<4x222xf32>,
    %6 = vector.extract_strided_slice %1 {offsets = [0, 2], sizes = [4, 222], strides = [1, 1]} : vector<4x256xf32> to vector<4x222xf32>
    %c8 = arith.constant 8 : index
    %c0_5 = arith.constant 0 : index
    %7 = vector.load %arg5[%c8, %c0_5] : memref<36x222xf32, #tpu.memory_space<vmem>>, vector<4x222xf32>
    tpu.vector_store %arg5[%c8, %c0_5], %6 {strides = array<i32>} : memref<36x222xf32, #tpu.memory_space<vmem>>, vector<4x222xf32>,
    %8 = vector.extract_strided_slice %1 {offsets = [0, 16], sizes = [4, 222], strides = [1, 1]} : vector<4x256xf32> to vector<4x222xf32>
    %c12 = arith.constant 12 : index
    %c0_6 = arith.constant 0 : index
    %9 = vector.load %arg5[%c12, %c0_6] : memref<36x222xf32, #tpu.memory_space<vmem>>, vector<4x222xf32>
    tpu.vector_store %arg5[%c12, %c0_6], %8 {strides = array<i32>} : memref<36x222xf32, #tpu.memory_space<vmem>>, vector<4x222xf32>,
    %10 = vector.extract_strided_slice %1 {offsets = [0, 17], sizes = [4, 222], strides = [1, 1]} : vector<4x256xf32> to vector<4x222xf32>
    %c16 = arith.constant 16 : index
    %c0_7 = arith.constant 0 : index
    %11 = vector.load %arg5[%c16, %c0_7] : memref<36x222xf32, #tpu.memory_space<vmem>>, vector<4x222xf32>
    tpu.vector_store %arg5[%c16, %c0_7], %10 {strides = array<i32>} : memref<36x222xf32, #tpu.memory_space<vmem>>, vector<4x222xf32>,
    %12 = vector.extract_strided_slice %1 {offsets = [0, 18], sizes = [4, 222], strides = [1, 1]} : vector<4x256xf32> to vector<4x222xf32>
    %c20 = arith.constant 20 : index
    %c0_8 = arith.constant 0 : index
    %13 = vector.load %arg5[%c20, %c0_8] : memref<36x222xf32, #tpu.memory_space<vmem>>, vector<4x222xf32>
    tpu.vector_store %arg5[%c20, %c0_8], %12 {strides = array<i32>} : memref<36x222xf32, #tpu.memory_space<vmem>>, vector<4x222xf32>,
    %14 = vector.extract_strided_slice %1 {offsets = [0, 32], sizes = [4, 222], strides = [1, 1]} : vector<4x256xf32> to vector<4x222xf32>
    %c24 = arith.constant 24 : index
    %c0_9 = arith.constant 0 : index
    %15 = vector.load %arg5[%c24, %c0_9] : memref<36x222xf32, #tpu.memory_space<vmem>>, vector<4x222xf32>
    tpu.vector_store %arg5[%c24, %c0_9], %14 {strides = array<i32>} : memref<36x222xf32, #tpu.memory_space<vmem>>, vector<4x222xf32>,
    %16 = vector.extract_strided_slice %1 {offsets = [0, 33], sizes = [4, 222], strides = [1, 1]} : vector<4x256xf32> to vector<4x222xf32>
    %c28 = arith.constant 28 : index
    %c0_10 = arith.constant 0 : index
    %17 = vector.load %arg5[%c28, %c0_10] : memref<36x222xf32, #tpu.memory_space<vmem>>, vector<4x222xf32>
    tpu.vector_store %arg5[%c28, %c0_10], %16 {strides = array<i32>} : memref<36x222xf32, #tpu.memory_space<vmem>>, vector<4x222xf32>,
    %18 = vector.extract_strided_slice %1 {offsets = [0, 34], sizes = [4, 222], strides = [1, 1]} : vector<4x256xf32> to vector<4x222xf32>
    %c32 = arith.constant 32 : index
    %c0_11 = arith.constant 0 : index
    %19 = vector.load %arg5[%c32, %c0_11] : memref<36x222xf32, #tpu.memory_space<vmem>>, vector<4x222xf32>
    tpu.vector_store %arg5[%c32, %c0_11], %18 {strides = array<i32>} : memref<36x222xf32, #tpu.memory_space<vmem>>, vector<4x222xf32>,
    %c0_12 = arith.constant 0 : index
    %c0_13 = arith.constant 0 : index
    %20 = vector.load %arg2[%c0_12, %c0_13] : memref<8x36xf32, #tpu.memory_space<vmem>>, vector<8x36xf32>
    %c0_14 = arith.constant 0 : index
    %c0_15 = arith.constant 0 : index
    %21 = vector.load %arg5[%c0_14, %c0_15] : memref<36x222xf32, #tpu.memory_space<vmem>>, vector<36x222xf32>
    %cst = arith.constant dense<0.000000e+00> : vector<8x222xf32>
    %22 = tpu.matmul %20, %21, %cst {dimension_numbers = #tpu.dot_dimension_numbers<[1], [0], [0], [1], [0, 0, 1, 1], [], []>} : vector<8x36xf32>, vector<36x222xf32>, vector<8x222xf32> -> vector<8x222xf32>
    %c0_16 = arith.constant 0 : index
    %c0_17 = arith.constant 0 : index
    %23 = vector.load %arg3[%c0_16, %c0_17] : memref<8x1xf32, #tpu.memory_space<vmem>>, vector<8x1xf32>
    %24 = vector.broadcast %23 : vector<8x1xf32> to vector<8x222xf32>
    %25 = arith.addf %22, %24 : vector<8x222xf32>
    %26 = vector.extract_strided_slice %25 {offsets = [0, 0], sizes = [8, 14], strides = [1, 1]} : vector<8x222xf32> to vector<8x14xf32>
    %c0_18 = arith.constant 0 : index
    %c0_19 = arith.constant 0 : index
    %c0_20 = arith.constant 0 : index
    %27 = vector.load %arg4[%c0_18, %c0_19, %c0_20] : memref<1x8x196xf32, #tpu.memory_space<vmem>>, vector<1x8x14xf32>
    %28 = vector.shape_cast %27 : vector<1x8x14xf32> to vector<8x14xf32>
    %29 = vector.shape_cast %26 : vector<8x14xf32> to vector<1x8x14xf32>
    tpu.vector_store %arg4[%c0_18, %c0_19, %c0_20], %29 {strides = array<i32>} : memref<1x8x196xf32, #tpu.memory_space<vmem>>, vector<1x8x14xf32>,
    %30 = vector.extract_strided_slice %25 {offsets = [0, 16], sizes = [8, 14], strides = [1, 1]} : vector<8x222xf32> to vector<8x14xf32>
    %c0_21 = arith.constant 0 : index
    %c0_22 = arith.constant 0 : index
    %c14 = arith.constant 14 : index
    %31 = vector.load %arg4[%c0_21, %c0_22, %c14] : memref<1x8x196xf32, #tpu.memory_space<vmem>>, vector<1x8x14xf32>
    %32 = vector.shape_cast %31 : vector<1x8x14xf32> to vector<8x14xf32>
    %33 = vector.shape_cast %30 : vector<8x14xf32> to vector<1x8x14xf32>
    tpu.vector_store %arg4[%c0_21, %c0_22, %c14], %33 {strides = array<i32>} : memref<1x8x196xf32, #tpu.memory_space<vmem>>, vector<1x8x14xf32>,
    %34 = vector.extract_strided_slice %25 {offsets = [0, 32], sizes = [8, 14], strides = [1, 1]} : vector<8x222xf32> to vector<8x14xf32>
    %c0_23 = arith.constant 0 : index
    %c0_24 = arith.constant 0 : index
    %c28_25 = arith.constant 28 : index
    %35 = vector.load %arg4[%c0_23, %c0_24, %c28_25] : memref<1x8x196xf32, #tpu.memory_space<vmem>>, vector<1x8x14xf32>
    %36 = vector.shape_cast %35 : vector<1x8x14xf32> to vector<8x14xf32>
    %37 = vector.shape_cast %34 : vector<8x14xf32> to vector<1x8x14xf32>
    tpu.vector_store %arg4[%c0_23, %c0_24, %c28_25], %37 {strides = array<i32>} : memref<1x8x196xf32, #tpu.memory_space<vmem>>, vector<1x8x14xf32>,
    %38 = vector.extract_strided_slice %25 {offsets = [0, 48], sizes = [8, 14], strides = [1, 1]} : vector<8x222xf32> to vector<8x14xf32>
    %c0_26 = arith.constant 0 : index
    %c0_27 = arith.constant 0 : index
    %c42 = arith.constant 42 : index
    %39 = vector.load %arg4[%c0_26, %c0_27, %c42] : memref<1x8x196xf32, #tpu.memory_space<vmem>>, vector<1x8x14xf32>
    %40 = vector.shape_cast %39 : vector<1x8x14xf32> to vector<8x14xf32>
    %41 = vector.shape_cast %38 : vector<8x14xf32> to vector<1x8x14xf32>
    tpu.vector_store %arg4[%c0_26, %c0_27, %c42], %41 {strides = array<i32>} : memref<1x8x196xf32, #tpu.memory_space<vmem>>, vector<1x8x14xf32>,
    %42 = vector.extract_strided_slice %25 {offsets = [0, 64], sizes = [8, 14], strides = [1, 1]} : vector<8x222xf32> to vector<8x14xf32>
    %c0_28 = arith.constant 0 : index
    %c0_29 = arith.constant 0 : index
    %c56 = arith.constant 56 : index
    %43 = vector.load %arg4[%c0_28, %c0_29, %c56] : memref<1x8x196xf32, #tpu.memory_space<vmem>>, vector<1x8x14xf32>
    %44 = vector.shape_cast %43 : vector<1x8x14xf32> to vector<8x14xf32>
    %45 = vector.shape_cast %42 : vector<8x14xf32> to vector<1x8x14xf32>
    tpu.vector_store %arg4[%c0_28, %c0_29, %c56], %45 {strides = array<i32>} : memref<1x8x196xf32, #tpu.memory_space<vmem>>, vector<1x8x14xf32>,
    %46 = vector.extract_strided_slice %25 {offsets = [0, 80], sizes = [8, 14], strides = [1, 1]} : vector<8x222xf32> to vector<8x14xf32>
    %c0_30 = arith.constant 0 : index
    %c0_31 = arith.constant 0 : index
    %c70 = arith.constant 70 : index
    %47 = vector.load %arg4[%c0_30, %c0_31, %c70] : memref<1x8x196xf32, #tpu.memory_space<vmem>>, vector<1x8x14xf32>
    %48 = vector.shape_cast %47 : vector<1x8x14xf32> to vector<8x14xf32>
    %49 = vector.shape_cast %46 : vector<8x14xf32> to vector<1x8x14xf32>
    tpu.vector_store %arg4[%c0_30, %c0_31, %c70], %49 {strides = array<i32>} : memref<1x8x196xf32, #tpu.memory_space<vmem>>, vector<1x8x14xf32>,
    %50 = vector.extract_strided_slice %25 {offsets = [0, 96], sizes = [8, 14], strides = [1, 1]} : vector<8x222xf32> to vector<8x14xf32>
    %c0_32 = arith.constant 0 : index
    %c0_33 = arith.constant 0 : index
    %c84 = arith.constant 84 : index
    %51 = vector.load %arg4[%c0_32, %c0_33, %c84] : memref<1x8x196xf32, #tpu.memory_space<vmem>>, vector<1x8x14xf32>
    %52 = vector.shape_cast %51 : vector<1x8x14xf32> to vector<8x14xf32>
    %53 = vector.shape_cast %50 : vector<8x14xf32> to vector<1x8x14xf32>
    tpu.vector_store %arg4[%c0_32, %c0_33, %c84], %53 {strides = array<i32>} : memref<1x8x196xf32, #tpu.memory_space<vmem>>, vector<1x8x14xf32>,
    %54 = vector.extract_strided_slice %25 {offsets = [0, 112], sizes = [8, 14], strides = [1, 1]} : vector<8x222xf32> to vector<8x14xf32>
    %c0_34 = arith.constant 0 : index
    %c0_35 = arith.constant 0 : index
    %c98 = arith.constant 98 : index
    %55 = vector.load %arg4[%c0_34, %c0_35, %c98] : memref<1x8x196xf32, #tpu.memory_space<vmem>>, vector<1x8x14xf32>
    %56 = vector.shape_cast %55 : vector<1x8x14xf32> to vector<8x14xf32>
    %57 = vector.shape_cast %54 : vector<8x14xf32> to vector<1x8x14xf32>
    tpu.vector_store %arg4[%c0_34, %c0_35, %c98], %57 {strides = array<i32>} : memref<1x8x196xf32, #tpu.memory_space<vmem>>, vector<1x8x14xf32>,
    %58 = vector.extract_strided_slice %25 {offsets = [0, 128], sizes = [8, 14], strides = [1, 1]} : vector<8x222xf32> to vector<8x14xf32>
    %c0_36 = arith.constant 0 : index
    %c0_37 = arith.constant 0 : index
    %c112 = arith.constant 112 : index
    %59 = vector.load %arg4[%c0_36, %c0_37, %c112] : memref<1x8x196xf32, #tpu.memory_space<vmem>>, vector<1x8x14xf32>
    %60 = vector.shape_cast %59 : vector<1x8x14xf32> to vector<8x14xf32>
    %61 = vector.shape_cast %58 : vector<8x14xf32> to vector<1x8x14xf32>
    tpu.vector_store %arg4[%c0_36, %c0_37, %c112], %61 {strides = array<i32>} : memref<1x8x196xf32, #tpu.memory_space<vmem>>, vector<1x8x14xf32>,
    %62 = vector.extract_strided_slice %25 {offsets = [0, 144], sizes = [8, 14], strides = [1, 1]} : vector<8x222xf32> to vector<8x14xf32>
    %c0_38 = arith.constant 0 : index
    %c0_39 = arith.constant 0 : index
    %c126 = arith.constant 126 : index
    %63 = vector.load %arg4[%c0_38, %c0_39, %c126] : memref<1x8x196xf32, #tpu.memory_space<vmem>>, vector<1x8x14xf32>
    %64 = vector.shape_cast %63 : vector<1x8x14xf32> to vector<8x14xf32>
    %65 = vector.shape_cast %62 : vector<8x14xf32> to vector<1x8x14xf32>
    tpu.vector_store %arg4[%c0_38, %c0_39, %c126], %65 {strides = array<i32>} : memref<1x8x196xf32, #tpu.memory_space<vmem>>, vector<1x8x14xf32>,
    %66 = vector.extract_strided_slice %25 {offsets = [0, 160], sizes = [8, 14], strides = [1, 1]} : vector<8x222xf32> to vector<8x14xf32>
    %c0_40 = arith.constant 0 : index
    %c0_41 = arith.constant 0 : index
    %c140 = arith.constant 140 : index
    %67 = vector.load %arg4[%c0_40, %c0_41, %c140] : memref<1x8x196xf32, #tpu.memory_space<vmem>>, vector<1x8x14xf32>
    %68 = vector.shape_cast %67 : vector<1x8x14xf32> to vector<8x14xf32>
    %69 = vector.shape_cast %66 : vector<8x14xf32> to vector<1x8x14xf32>
    tpu.vector_store %arg4[%c0_40, %c0_41, %c140], %69 {strides = array<i32>} : memref<1x8x196xf32, #tpu.memory_space<vmem>>, vector<1x8x14xf32>,
    %70 = vector.extract_strided_slice %25 {offsets = [0, 176], sizes = [8, 14], strides = [1, 1]} : vector<8x222xf32> to vector<8x14xf32>
    %c0_42 = arith.constant 0 : index
    %c0_43 = arith.constant 0 : index
    %c154 = arith.constant 154 : index
    %71 = vector.load %arg4[%c0_42, %c0_43, %c154] : memref<1x8x196xf32, #tpu.memory_space<vmem>>, vector<1x8x14xf32>
    %72 = vector.shape_cast %71 : vector<1x8x14xf32> to vector<8x14xf32>
    %73 = vector.shape_cast %70 : vector<8x14xf32> to vector<1x8x14xf32>
    tpu.vector_store %arg4[%c0_42, %c0_43, %c154], %73 {strides = array<i32>} : memref<1x8x196xf32, #tpu.memory_space<vmem>>, vector<1x8x14xf32>,
    %74 = vector.extract_strided_slice %25 {offsets = [0, 192], sizes = [8, 14], strides = [1, 1]} : vector<8x222xf32> to vector<8x14xf32>
    %c0_44 = arith.constant 0 : index
    %c0_45 = arith.constant 0 : index
    %c168 = arith.constant 168 : index
    %75 = vector.load %arg4[%c0_44, %c0_45, %c168] : memref<1x8x196xf32, #tpu.memory_space<vmem>>, vector<1x8x14xf32>
    %76 = vector.shape_cast %75 : vector<1x8x14xf32> to vector<8x14xf32>
    %77 = vector.shape_cast %74 : vector<8x14xf32> to vector<1x8x14xf32>
    tpu.vector_store %arg4[%c0_44, %c0_45, %c168], %77 {strides = array<i32>} : memref<1x8x196xf32, #tpu.memory_space<vmem>>, vector<1x8x14xf32>,
    %78 = vector.extract_strided_slice %25 {offsets = [0, 208], sizes = [8, 14], strides = [1, 1]} : vector<8x222xf32> to vector<8x14xf32>
    %c0_46 = arith.constant 0 : index
    %c0_47 = arith.constant 0 : index
    %c182 = arith.constant 182 : index
    %79 = vector.load %arg4[%c0_46, %c0_47, %c182] : memref<1x8x196xf32, #tpu.memory_space<vmem>>, vector<1x8x14xf32>
    %80 = vector.shape_cast %79 : vector<1x8x14xf32> to vector<8x14xf32>
    %81 = vector.shape_cast %78 : vector<8x14xf32> to vector<1x8x14xf32>
    tpu.vector_store %arg4[%c0_46, %c0_47, %c182], %81 {strides = array<i32>} : memref<1x8x196xf32, #tpu.memory_space<vmem>>, vector<1x8x14xf32>,
    return
  }
  func.func @transform_0(%arg0: i32) -> (i32, i32, i32) {
    %c0_i32 = arith.constant 0 : i32
    %c0_i32_0 = arith.constant 0 : i32
    %c0_i32_1 = arith.constant 0 : i32
    return %arg0, %c0_i32, %c0_i32_0 : i32, i32, i32
  }
  func.func @transform_1(%arg0: i32) -> (i32, i32) {
    %c0_i32 = arith.constant 0 : i32
    %c0_i32_0 = arith.constant 0 : i32
    %c0_i32_1 = arith.constant 0 : i32
    return %c0_i32, %c0_i32_0 : i32, i32
  }
  func.func @transform_2(%arg0: i32) -> (i32, i32) {
    %c0_i32 = arith.constant 0 : i32
    %c0_i32_0 = arith.constant 0 : i32
    %c0_i32_1 = arith.constant 0 : i32
    return %c0_i32, %c0_i32_0 : i32, i32
  }
  func.func @transform_3(%arg0: i32) -> (i32, i32, i32) {
    %c0_i32 = arith.constant 0 : i32
    %c0_i32_0 = arith.constant 0 : i32
    %c0_i32_1 = arith.constant 0 : i32
    return %arg0, %c0_i32, %c0_i32_0 : i32, i32, i32
  }
}

</mosaic_0001>

<bundles_post_ra>
// kernel: concat_conv2d.1
= control target key start
LH: loop header
LB: loop body
LE: loop exit
PB: predicated region body
PF: predicated region fallthrough
CT: control target
= control target key end

     0   :  { %s577_s12 = smov 0   ;;  %s639_s0 = inlined_call_operand.vmem [shape: f32[2,4,256], index: 0, kind: input, shape index: {}]   ;;  %s640_s1 = inlined_call_operand.vmem [shape: f32[8,36], index: 1, kind: input, shape index: {}]   ;;  %s641_s2 = inlined_call_operand.vmem [shape: f32[8,1], index: 2, kind: input, shape index: {}]   ;;  %s642_s3 = inlined_call_operand.vmem [shape: f32[2,8,196], index: 3, kind: output, shape index: {}]  }
   0x1 LB: > { %s484_s13 = sadd.s32 4294967295, %s536_s12   ;;  %p488_p0 = scmp.ge.s32.totalorder %s536_s12, 1  ;;  %s536_s12 = sphi %s577_s12, %s13_s12  }
   0x2   : > { %p137_p1 = scmp.lt.s32.totalorder %s536_s12, 3 }
   0x4   : > { %p138_p2 = pnand %p488_p0, %p137_p1 }
   0x5   : > { %p161_p3 = scmp.lt.s32.totalorder (!%p138_p2), %s484_s13, 1  ;;  %s538_s18 = smov (!%p138_p2), 126  }
   0x6   : > { %141 = sbr.rel (%p138_p2) target bundleno = 498 (0x1f2), region = 32  ;;  %s539_s19 = smov (!%p138_p2), 112  }
   0x7   : > { %s540_s20 = smov (!%p138_p2), 111   ;;  %s541_s21 = smov (!%p138_p2), 110  }
   0x8   : > { %s542_s22 = smov (!%p138_p2), 96   ;;  %s543_s23 = smov (!%p138_p2), 95  }
   0x9   : > { %s544_s24 = smov (!%p138_p2), 94   ;;  %s545_s25 = smov (!%p138_p2), 127  }
   0xa   : > { %s547_s7 = smov (!%p138_p2), 106   ;;  %s548_s8 = smov (!%p138_p2), 108  }
   0xb   : > { %s644_s13 = smov (!%p161_p3, %s484_s13), 1  ;;  %vm179_vm0 = vcmask 764928   ;;  %vm203_vm1 = vcmask 1031168   ;;  %vm230_vm2 = vcmask 908288   ;;  %vm194_vm3 = vcmask 769028   ;;  %v301_v35 = vld [vmem:[%s641_s2] sm:$0xff] }
   0xc   : > { %s499_s14 = sshll.u32 %s644_s13, 3  ;;  %vm244_vm4 = vcmask 900096   ;;  %vm271_vm5 = vcmask 777216   ;;  %vm257_vm6 = vcmask 785408   ;;  %v546_v36 = vmov 0   ;;  %v290_v53 = vld [vmem:[%s640_s1] sm:$0xff] }
   0xd   : > { %s165_s17 = scalar_lea.vmem %s639_s0, %s499_s14  ;;  %528 = vset.pattern.permute.xlu1 %v546_v36  ;;  %529 = vset.pattern.permute.xlu0 %v546_v36  ;;  %vm217_vm7 = vcmask 916480   ;;  %vm284_vm8 = vcmask 769024   ;;  %vm189_vm9 = vcmask 1039360   ;;  %vm311_vm10 = vcmask 1043456   ;;  %s500_s30 = sshll.u32 %s644_s13, 4 }
   0xe   : > { %v171_v0 = vld [vmem:[%s165_s17] sm:$0xff]  ;;  %vm307_vm11 = vcmask 293888   ;;  %s616_s6 = scalar_lea.vmem %s642_s3, %s500_s30  ;;  %vm358_vm12 = vcmask 113664   ;;  %s549_s9 = smov 124   ;;  %vm364_vm13 = vcmask 228464   ;;  %vm407_vm14 = vcmask 97280  }
   0xf   : > { %173 = vst [vmem:[#allocation1] ss:$2 sm:$0xff] %v171_v0  ;;  %s550_s10 = smov 122   ;;  %s551_s11 = smov 118   ;;  %vm412_vm15 = vcmask 212064  }
  0x10   : > { %s552_s13 = smov 120   ;;  %s553_s14 = smov 114  }
  0x11   : > { %s554_s15 = smov 116   ;;  %s555_s16 = smov 104  }
  0x12   : > { %s556_s17 = smov 102  }
  0x16   : > { %v174_v1 = vld.sshfl [vmem:[#allocation1] sm:$0xff pattern:$0x75316420]  ;;  %v175_v2 = vld.sshfl [vmem:[#allocation1 + $0x8] sm:$0xff pattern:$0x75316420] }
  0x17   : > { %182 = vst [vmem:[#allocation1 + $0x1] ss:$2 sm:$0xff] %v171_v0 }
  0x18   : > { %178 = vst [vmem:[#allocation2] sm:$0xf] %v174_v1 }
  0x19   : > { %180 = vst.msk [vmem:[#allocation2 + $0x8] sm:$0xf] %vm179_vm0, %v175_v2 }
  0x1e   : > { %v183_v3 = vld.sshfl [vmem:[#allocation1] sm:$0xff pattern:$0x75316420]  ;;  %v184_v4 = vld.sshfl [vmem:[#allocation1 + $0x8] sm:$0xff pattern:$0x75316420] }
  0x1f   : > { %196 = vst [vmem:[#allocation1] ss:$2 sm:$0xff] %v171_v0 }
  0x26   : > { %v197_v5 = vld.sshfl [vmem:[#allocation1] sm:$0xff pattern:$0x75316420]  ;;  %v198_v6 = vld.sshfl [vmem:[#allocation1 + $0x8] sm:$0xff pattern:$0x75316420] }
  0x27   : > { %199 = vrot.lane.b32.xlu1 %v197_v5, %s538_s18  ;;  %210 = vst [vmem:[#allocation1 + $0x1] ss:$2 sm:$0xff] %v171_v0  ;;  %201 = vrot.lane.b32.xlu2 %v198_v6, %s538_s18 }
  0x2e   : > { %v211_v7 = vld.sshfl [vmem:[#allocation1] sm:$0xff pattern:$0x75316420]  ;;  %v212_v8 = vld.sshfl [vmem:[#allocation1 + $0x8] sm:$0xff pattern:$0x75316420] }
  0x2f   : > { %213 = vrot.lane.b32.xlu0 %v211_v7, %s539_s19  ;;  %223 = vst [vmem:[#allocation1] ss:$2 sm:$0xff] %v171_v0 }
  0x36   : > { %v225_v9 = vld.sshfl [vmem:[#allocation1 + $0x8] sm:$0xff pattern:$0x75316420]  ;;  %v224_v10 = vld.sshfl [vmem:[#allocation1] sm:$0xff pattern:$0x75316420] }
  0x37   : > { %228 = vrot.lane.b32.xlu1 %v225_v9, %s540_s20  ;;  %226 = vrot.lane.b32.xlu0 %v224_v10, %s540_s20  ;;  %237 = vst [vmem:[#allocation1 + $0x1] ss:$2 sm:$0xff] %v171_v0 }
  0x3e   : > { %v239_v11 = vld.sshfl [vmem:[#allocation1 + $0x8] sm:$0xff pattern:$0x75316420]  ;;  %v238_v12 = vld.sshfl [vmem:[#allocation1] sm:$0xff pattern:$0x75316420] }
  0x3f   : > { %242 = vrot.lane.b32.xlu0 %v239_v11, %s541_s21  ;;  %250 = vst [vmem:[#allocation1] ss:$2 sm:$0xff] %v171_v0  ;;  %240 = vrot.lane.b32.xlu2 %v238_v12, %s541_s21 }
  0x46   : > { %v251_v13 = vld.sshfl [vmem:[#allocation1] sm:$0xff pattern:$0x75316420]  ;;  %v252_v14 = vld.sshfl [vmem:[#allocation1 + $0x8] sm:$0xff pattern:$0x75316420] }
  0x47   : > { %253 = vrot.lane.b32.xlu1 %v251_v13, %s542_s22  ;;  %264 = vst [vmem:[#allocation1 + $0x1] ss:$2 sm:$0xff] %v171_v0 }
  0x4e   : > { %v265_v15 = vld.sshfl [vmem:[#allocation1] sm:$0xff pattern:$0x75316420]  ;;  %v266_v16 = vld.sshfl [vmem:[#allocation1 + $0x8] sm:$0xff pattern:$0x75316420] }
  0x4f   : > { %255 = vrot.lane.b32.xlu1 %v252_v14, %s542_s22  ;;  %277 = vst [vmem:[#allocation1] ss:$2 sm:$0xff] %v171_v0  ;;  %267 = vrot.lane.b32.xlu2 %v265_v15, %s543_s23 }
  0x56   : > { %v278_v17 = vld.sshfl [vmem:[#allocation1] sm:$0xff pattern:$0x75316420]  ;;  %v279_v18 = vld.sshfl [vmem:[#allocation1 + $0x8] sm:$0xff pattern:$0x75316420] }
  0x57   : > { %215 = vrot.lane.b32.xlu1 %v212_v8, %s539_s19  ;;  %280 = vrot.lane.b32.xlu0 %v278_v17, %s544_s24 }
  0x58   : > { %269 = vrot.lane.b32.xlu2 %v266_v16, %s543_s23 }
  0x5f   : > { %282 = vrot.lane.b32.xlu0 %v279_v18, %s544_s24  ;;  %304 = vperm.xlu1 %528, %v301_v35  }
  0x60   : > { %185 = vrot.lane.b32.xlu2 %v183_v3, %s545_s25 }
  0x67   : > { %187 = vrot.lane.b32.xlu0 %v184_v4, %s545_s25 }
  0x81   : > { %v202_v19 = vpop.permute.xlu2 %201 }
  0x82   : > { %208 = vst.msk [vmem:[#allocation2 + $0x18] sm:$0xf] %vm179_vm0, %v202_v19 }
  0x99   : > { %v200_v20 = vpop.permute.xlu1 %199  ;;  %v241_v22 = vpop.permute.xlu2 %240 }
  0x9a   : > { %v204_v21 = vsel %vm203_vm1, %v200_v20, %v202_v19  ;;  %vm369_vm1 = vcmask 343264  }
  0x9b   : > { %207 = vst [vmem:[#allocation2 + $0x10] sm:$0xf] %v204_v21 }
  0xa1   : > { %v214_v23 = vpop.permute.xlu0 %213 }
  0xa9   : > { %v229_v24 = vpop.permute.xlu1 %228  ;;  %v227_v25 = vpop.permute.xlu0 %226 }
  0xaa   : > { %235 = vst.msk [vmem:[#allocation2 + $0x28] sm:$0xf] %vm179_vm0, %v229_v24  ;;  %v231_v26 = vsel %vm230_vm2, %v227_v25, %v229_v24  ;;  %v268_v27 = vpop.permute.xlu2 %267  ;;  %vm374_vm2 = vcmask 458064  }
  0xab   : > { %234 = vst [vmem:[#allocation2 + $0x20] sm:$0xf] %v231_v26 }
  0xb1   : > { %v243_v28 = vpop.permute.xlu0 %242 }
  0xb2   : > { %v245_v29 = vsel %vm244_vm4, %v241_v22, %v243_v28  ;;  %249 = vst.msk [vmem:[#allocation2 + $0x28] sm:$0xf0] %vm194_vm3, %v243_v28  ;;  %v270_v30 = vpop.permute.xlu2 %269  ;;  %vm384_vm4 = vcmask 687664  }
  0xb3   : > { %248 = vst [vmem:[#allocation2 + $0x20] sm:$0xf0] %v245_v29  ;;  %v272_v31 = vsel %vm271_vm5, %v268_v27, %v270_v30  ;;  %vm389_vm5 = vcmask 802464  }
  0xb4   : > { %275 = vst [vmem:[#allocation2 + $0x30] sm:$0xf0] %v272_v31 }
  0xb5   : > { %276 = vst.msk [vmem:[#allocation2 + $0x38] sm:$0xf0] %vm194_vm3, %v270_v30 }
  0xb9   : > { %v254_v32 = vpop.permute.xlu1 %253  ;;  %v296_v49 = vld [vmem:[#allocation2 + $0x28] sm:$0xff] }
  0xba   : > { %v186_v42 = vpop.permute.xlu2 %185  ;;  %v295_v50 = vld [vmem:[#allocation2 + $0x20] sm:$0xff] }
  0xc1   : > { %v256_v33 = vpop.permute.xlu1 %255 }
  0xc2   : > { %v258_v34 = vsel %vm257_vm6, %v254_v32, %v256_v33  ;;  %262 = vst.msk [vmem:[#allocation2 + $0x38] sm:$0xf] %vm179_vm0, %v256_v33  ;;  %vm394_vm6 = vcmask 917264  }
  0xc3   : > { %261 = vst [vmem:[#allocation2 + $0x30] sm:$0xf] %v258_v34 }
  0xc9   : > { %v216_v37 = vpop.permute.xlu1 %215  ;;  %v281_v38 = vpop.permute.xlu0 %280  ;;  %v298_v47 = vld [vmem:[#allocation2 + $0x38] sm:$0xff] }
  0xca   : > { %v218_v39 = vsel %vm217_vm7, %v214_v23, %v216_v37  ;;  %222 = vst.msk [vmem:[#allocation2 + $0x18] sm:$0xf0] %vm194_vm3, %v216_v37  ;;  %v297_v48 = vld [vmem:[#allocation2 + $0x30] sm:$0xff]  ;;  %vm400_vm7 = vcmask 1032064  }
  0xcb   : > { %221 = vst [vmem:[#allocation2 + $0x10] sm:$0xf0] %v218_v39 }
  0xd1   : > { %v283_v40 = vpop.permute.xlu0 %282  ;;  %v294_v51 = vld [vmem:[#allocation2 + $0x18] sm:$0xff]  ;;  %v305_v56 = vpop.permute.xlu1 %304 }
  0xd2   : > { %v285_v41 = vsel %vm284_vm8, %v281_v38, %v283_v40  ;;  %289 = vst.msk [vmem:[#allocation2 + $0x48] sm:$0xf] %vm179_vm0, %v283_v40  ;;  %v293_v52 = vld [vmem:[#allocation2 + $0x10] sm:$0xff]  ;;  %vm417_vm0 = vcmask 326864   ;;  %vm422_vm8 = vcmask 441664  }
  0xd3   : > { %288 = vst [vmem:[#allocation2 + $0x40] sm:$0xf] %v285_v41 }
  0xd9   : > { %v188_v43 = vpop.permute.xlu0 %187  ;;  %v300_v44 = vld [vmem:[#allocation2 + $0x48] sm:$0xf] }
  0xda   : > { %v190_v45 = vsel %vm189_vm9, %v186_v42, %v188_v43  ;;  %195 = vst.msk [vmem:[#allocation2 + $0x8] sm:$0xf0] %vm194_vm3, %v188_v43  ;;  %495 = vmatpush.msk.msra.mxu1 %vm311_vm10, %v300_v44  ;;  %v299_v46 = vld [vmem:[#allocation2 + $0x40] sm:$0xf]  ;;  %vm379_vm3 = vcmask 572864   ;;  %vm427_vm9 = vcmask 556464  }
  0xdb   : > { %193 = vst [vmem:[#allocation2] sm:$0xf0] %v190_v45  ;;  %493 = vmatpush.msk.msra.mxu0 %vm311_vm10, %v299_v46  ;;  %vm405_vm10 = vcmask 1048560  }
  0xdc   : > { %350 = vmatpush.msra.mxu1 %v298_v47 }
  0xdd   : > { %330 = vmatpush.msra.mxu0 %v297_v48 }
  0xde   : > { %351 = vmatpush.msra.mxu1 %v296_v49 }
  0xdf   : > { %331 = vmatpush.msra.mxu0 %v295_v50 }
  0xe0   : > { %352 = vmatpush.msra.mxu1 %v294_v51 }
  0xe1   : > { %332 = vmatpush.msra.mxu0 %v293_v52  ;;  %v292_v54 = vld [vmem:[#allocation2 + $0x8] sm:$0xff] }
  0xe2   : > { %353 = vmatpush.msra.mxu1 %v292_v54  ;;  %v291_v55 = vld [vmem:[#allocation2] sm:$0xff] }
  0xe3   : > { %333 = vmatpush.msra.mxu0 %v291_v55  ;;  %496 = vmatmul.msk.f32.vlgmr.msra.gmra.mxu1 %vm307_vm11, %v290_v53 }
  0xe4   : > { %494 = vmatmul.msk.f32.vlgmr.msra.gmra.mxu0 %vm307_vm11, %v290_v53 }
 0x160   : > { %v355_v57 = vpop.f32.mrf.mxu1 }
 0x161   : > { %v356_v58 = vadd.f32 %v355_v57, %v305_v56  ;;  %v335_v59 = vpop.f32.mrf.mxu0 }
 0x162   : > { %v336_v60 = vadd.f32 %v335_v59, %v305_v56 }
 0x163   : > { %414 = vrot.lane.b32.xlu2 %v356_v58, %s547_s7  ;;  %409 = vrot.lane.b32.xlu0 %v356_v58, %s548_s8 }
 0x164   : > { %402 = vrot.lane.b32.xlu1 %v356_v58, %s541_s21  ;;  %359 = vst.msk [vmem:[%s616_s6] sm:$0xff] %vm358_vm12, %v336_v60 }
 0x16b   : > { %366 = vrot.lane.b32.xlu0 %v336_v60, %s549_s9  ;;  %361 = vrot.lane.b32.xlu2 %v336_v60, %s538_s18 }
 0x16c   : > { %371 = vrot.lane.b32.xlu1 %v336_v60, %s550_s10 }
 0x173   : > { %381 = vrot.lane.b32.xlu0 %v336_v60, %s551_s11  ;;  %376 = vrot.lane.b32.xlu2 %v336_v60, %s552_s13 }
 0x174   : > { %391 = vrot.lane.b32.xlu1 %v336_v60, %s553_s14 }
 0x17b   : > { %397 = vrot.lane.b32.xlu0 %v356_v58, %s539_s19  ;;  %386 = vrot.lane.b32.xlu2 %v336_v60, %s554_s15 }
 0x17c   : > { %419 = vrot.lane.b32.xlu1 %v356_v58, %s555_s16 }
 0x183   : > { %424 = vrot.lane.b32.xlu2 %v356_v58, %s556_s17 }
 0x1bd   : > { %v415_v61 = vpop.permute.xlu2 %414 }
 0x1c5   : > { %v362_v62 = vpop.permute.xlu2 %361 }
 0x1c6   : > { %365 = vst.msk [vmem:[%s616_s6] sm:$0xff] %vm364_vm13, %v362_v62 }
 0x1cd   : > { %v377_v1 = vpop.permute.xlu2 %376 }
 0x1d5   : > { %v410_v63 = vpop.permute.xlu0 %409  ;;  %v387_v4 = vpop.permute.xlu2 %386 }
 0x1d6   : > { %v403_v0 = vpop.permute.xlu1 %402 }
 0x1d7   : > { %408 = vst.msk [vmem:[%s616_s6 + $0x8] sm:$0xff] %vm407_vm14, %v403_v0 }
 0x1d8   : > { %413 = vst.msk [vmem:[%s616_s6 + $0x8] sm:$0xff] %vm412_vm15, %v410_v63 }
 0x1d9   : > { %418 = vst.msk [vmem:[%s616_s6 + $0x8] sm:$0xff] %vm417_vm0, %v415_v61 }
 0x1dd   : > { %v367_v2 = vpop.permute.xlu0 %366  ;;  %v425_v9 = vpop.permute.xlu2 %424 }
 0x1de   : > { %v372_v3 = vpop.permute.xlu1 %371  ;;  %370 = vst.msk [vmem:[%s616_s6] sm:$0xff] %vm369_vm1, %v367_v2 }
 0x1df   : > { %375 = vst.msk [vmem:[%s616_s6] sm:$0xff] %vm374_vm2, %v372_v3 }
 0x1e0   : > { %380 = vst.msk [vmem:[%s616_s6] sm:$0xff] %vm379_vm3, %v377_v1 }
 0x1e5   : > { %v382_v5 = vpop.permute.xlu0 %381 }
 0x1e6   : > { %v392_v6 = vpop.permute.xlu1 %391  ;;  %385 = vst.msk [vmem:[%s616_s6] sm:$0xff] %vm384_vm4, %v382_v5 }
 0x1e7   : > { %390 = vst.msk [vmem:[%s616_s6] sm:$0xff] %vm389_vm5, %v387_v4 }
 0x1e8   : > { %395 = vst.msk [vmem:[%s616_s6] sm:$0xff] %vm394_vm6, %v392_v6 }
 0x1ed   : > { %v398_v7 = vpop.permute.xlu0 %397 }
 0x1ee   : > { %v420_v8 = vpop.permute.xlu1 %419  ;;  %401 = vst.msk [vmem:[%s616_s6] sm:$0xff] %vm400_vm7, %v398_v7 }
 0x1ef   : > { %423 = vst.msk [vmem:[%s616_s6 + $0x8] sm:$0xff] %vm422_vm8, %v420_v8 }
 0x1f0   : > { %428 = vst.msk [vmem:[%s616_s6 + $0x8] sm:$0xff] %vm427_vm9, %v425_v9 }
 0x1f1   : > { %406 = vst.msk [vmem:[%s616_s6] sm:$0xff] %vm405_vm10, %v403_v0 }
 0x1f2 PF: > { %s13_s12 = sadd.s32 1, %s536_s12  }
 0x1f3   : > { %p10_p4 = scmp.ge.s32.totalorder %s13_s12, 4  }
 0x1f5   :  { %12 = sbr.rel (!%p10_p4) target bundleno = 1 (0x1), region = 66 }

</bundles_post_ra>
